<compile_context>
chip_gen: v7x
topology: tpu7x:2x2x1
jax: 0.10.0
libtpu: 0.0.40
codegen_flags: <defaults>
</compile_context>

<pallas_src>
import functools

import jax
import jax.numpy as jnp
from jax import lax
from jax.experimental import pallas as pl
from jax.experimental.pallas import tpu as pltpu


# -----------------------------------------------------------------------------
# Pallas kernels
# -----------------------------------------------------------------------------
def _gemm_bias_relu_kernel(a_ref, w_ref, b_ref, o_ref):
    # out = relu(A @ W + bias)   (BN scale already folded into W columns)
    acc = jnp.dot(a_ref[...], w_ref[...], preferred_element_type=jnp.float32)
    o_ref[...] = jnp.maximum(acc + b_ref[...], 0.0).astype(o_ref.dtype)


def _gemm_bias_res_relu_kernel(a_ref, w_ref, b_ref, r_ref, o_ref):
    # out = relu(A @ W + bias + residual)   (identity shortcut: VPU add)
    acc = jnp.dot(a_ref[...], w_ref[...], preferred_element_type=jnp.float32)
    o_ref[...] = jnp.maximum(acc + b_ref[...] + r_ref[...], 0.0).astype(o_ref.dtype)


# -----------------------------------------------------------------------------
# pallas_call wrappers
# -----------------------------------------------------------------------------
_COMPILER_PARAMS = pltpu.CompilerParams(
    dimension_semantics=("parallel",),
)


def _gemm_bias_relu(a, w, b, tm, out_dtype):
    m, k = a.shape
    c = w.shape[1]
    return pl.pallas_call(
        _gemm_bias_relu_kernel,
        out_shape=jax.ShapeDtypeStruct((m, c), out_dtype),
        grid=(m // tm,),
        in_specs=[
            pl.BlockSpec((tm, k), lambda i: (i, 0)),
            pl.BlockSpec((k, c), lambda i: (0, 0)),
            pl.BlockSpec((1, c), lambda i: (0, 0)),
        ],
        out_specs=pl.BlockSpec((tm, c), lambda i: (i, 0)),
        compiler_params=_COMPILER_PARAMS,
    )(a, w, b)


def _gemm_bias_res_relu(a, w, b, r, tm, out_dtype):
    m, k = a.shape
    c = w.shape[1]
    return pl.pallas_call(
        _gemm_bias_res_relu_kernel,
        out_shape=jax.ShapeDtypeStruct((m, c), out_dtype),
        grid=(m // tm,),
        in_specs=[
            pl.BlockSpec((tm, k), lambda i: (i, 0)),
            pl.BlockSpec((k, c), lambda i: (0, 0)),
            pl.BlockSpec((1, c), lambda i: (0, 0)),
            pl.BlockSpec((tm, c), lambda i: (i, 0)),
        ],
        out_specs=pl.BlockSpec((tm, c), lambda i: (i, 0)),
        compiler_params=_COMPILER_PARAMS,
    )(a, w, b, r)


# -----------------------------------------------------------------------------
# Glue: im2col, BN folding, padding, parameter setup
# -----------------------------------------------------------------------------
def _round_up(x, m):
    return (x + m - 1) // m * m


def _choose_tm(m):
    """Largest tm <= 512 (mult. of 8) giving >= 2 grid steps where possible."""
    tm = 512
    while tm > 8 and m < 2 * tm:
        tm //= 2
    return max(tm, 8)


def _im2col(x_nhwc, ksize, stride):
    """x: (N,H,W,C) -> (N*Ho*Wo, ksize*ksize*C), row order (ky, kx, cin)."""
    n, h, w, c = x_nhwc.shape
    pad = 1 if ksize == 3 else 0
    xp = jnp.pad(x_nhwc, ((0, 0), (pad, pad), (pad, pad), (0, 0)))
    ho = (h + 2 * pad - ksize) // stride + 1
    wo = (w + 2 * pad - ksize) // stride + 1
    patches = []
    for ky in range(ksize):
        for kx in range(ksize):
            patches.append(
                xp[:, ky:ky + stride * ho:stride, kx:kx + stride * wo:stride, :])
    a = jnp.concatenate(patches, axis=-1)  # (N, Ho, Wo, k*k*C)
    return a.reshape(n * ho * wo, ksize * ksize * c), ho, wo


def _weight_to_mat(w_oihw):
    """(Cout, Cin, Kh, Kw) -> (Kh*Kw*Cin, Cout), matching _im2col row order."""
    cout, cin, kh, kw = w_oihw.shape
    return jnp.transpose(w_oihw, (2, 3, 1, 0)).reshape(kh * kw * cin, cout)


def _fold_bn(gamma, beta, mean, var, eps=1e-5):
    scale = gamma / jnp.sqrt(var + eps)
    bias = beta - mean * scale
    return scale.reshape(1, -1), bias.reshape(1, -1)


def _pad_cols(x, c_pad):
    return jnp.pad(x, ((0, 0), (0, c_pad - x.shape[1])))


def init_params(key, inchannel, outchannel, stride):
    ks = jax.random.split(key, 12)
    p = {
        "w1": 0.1 * jax.random.normal(ks[0], (outchannel, inchannel, 3, 3), jnp.float32),
        "bn1": (1.0 + 0.1 * jax.random.normal(ks[1], (outchannel,), jnp.float32),
                0.1 * jax.random.normal(ks[2], (outchannel,), jnp.float32),
                0.1 * jax.random.normal(ks[3], (outchannel,), jnp.float32),
                0.5 + jax.random.uniform(ks[4], (outchannel,), jnp.float32)),
        "w2": 0.1 * jax.random.normal(ks[5], (outchannel, outchannel, 3, 3), jnp.float32),
        "bn2": (1.0 + 0.1 * jax.random.normal(ks[6], (outchannel,), jnp.float32),
                0.1 * jax.random.normal(ks[7], (outchannel,), jnp.float32),
                0.1 * jax.random.normal(ks[8], (outchannel,), jnp.float32),
                0.5 + jax.random.uniform(ks[9], (outchannel,), jnp.float32)),
    }
    if stride != 1 or inchannel != outchannel:
        p["ws"] = 0.1 * jax.random.normal(
            ks[10], (outchannel, inchannel, 1, 1), jnp.float32)
        p["bns"] = (1.0 + 0.1 * jax.random.normal(ks[11], (outchannel,), jnp.float32),
                    jnp.zeros((outchannel,), jnp.float32) + 0.05,
                    jnp.zeros((outchannel,), jnp.float32),
                    jnp.ones((outchannel,), jnp.float32))
    return p


# -----------------------------------------------------------------------------
# ResidualBlock forward (Pallas)
# -----------------------------------------------------------------------------
@functools.partial(jax.jit, static_argnames=("stride",))
def residual_block_pallas(x_nchw, params, stride):
    n, cin, h, w = x_nchw.shape
    cout = params["w1"].shape[0]
    cp = _round_up(cout, 128)                # lane-dense output channels
    x = jnp.transpose(x_nchw, (0, 2, 3, 1))  # -> NHWC (f32)

    # --- conv1 (3x3, stride) + BN1 + ReLU --------------------------------
    a1, ho, wo = _im2col(x, 3, stride)       # (M, 9*Cin)
    m = a1.shape[0]
    tm = _choose_tm(m)
    mp = _round_up(m, tm)

    s1, b1 = _fold_bn(*params["bn1"])
    w1 = _pad_cols(_weight_to_mat(params["w1"]) * s1, cp).astype(jnp.bfloat16)
    b1p = _pad_cols(b1, cp)
    a1p = jnp.pad(a1, ((0, mp - m), (0, 0))).astype(jnp.bfloat16)

    y1 = _gemm_bias_relu(a1p, w1, b1p, tm, jnp.bfloat16)        # (mp, cp) bf16
    y1_nhwc = y1[:m, :cout].reshape(n, ho, wo, cout)

    # --- conv2 (3x3, s=1) + BN2, fused with shortcut + add + ReLU --------
    a2, _, _ = _im2col(y1_nhwc, 3, 1)        # (M, 9*Cout) bf16
    s2, b2 = _fold_bn(*params["bn2"])
    w2 = _weight_to_mat(params["w2"]) * s2

    if stride != 1 or cin != cout:
        # conv shortcut: fold into the same GEMM via K-concatenation.
        a_s, _, _ = _im2col(x, 1, stride)                    # (M, Cin)
        ss, bs = _fold_bn(*params["bns"])
        ws = _weight_to_mat(params["ws"]) * ss               # (Cin, Cout)

        a_cat = jnp.concatenate(
            [a2.astype(jnp.bfloat16), a_s.astype(jnp.bfloat16)], axis=1)
        a_cat = jnp.pad(a_cat, ((0, mp - m), (0, 0)))
        w_cat = _pad_cols(jnp.concatenate([w2, ws], axis=0), cp).astype(jnp.bfloat16)
        bias = _pad_cols(b2 + bs, cp)

        out = _gemm_bias_relu(a_cat, w_cat, bias, tm, jnp.float32)
    else:
        # identity shortcut: residual added on the VPU (no eye matmul).
        a2p = jnp.pad(a2.astype(jnp.bfloat16), ((0, mp - m), (0, 0)))
        w2p = _pad_cols(w2, cp).astype(jnp.bfloat16)
        b2p = _pad_cols(b2, cp)
        res = jnp.pad(x.reshape(m, cin), ((0, mp - m), (0, cp - cout)))  # f32

        out = _gemm_bias_res_relu(a2p, w2p, b2p, res, tm, jnp.float32)

    out = out[:m, :cout].reshape(n, ho, wo, cout)
    return jnp.transpose(out, (0, 3, 1, 2))  # -> NCHW


# -----------------------------------------------------------------------------
# Pure-JAX f32 reference (for correctness check)
# -----------------------------------------------------------------------------
def _conv_ref(x_nhwc, w_oihw, stride, pad):
    return lax.conv_general_dilated(
        x_nhwc, jnp.transpose(w_oihw, (2, 3, 1, 0)),
        window_strides=(stride, stride),
        padding=[(pad, pad), (pad, pad)],
        dimension_numbers=("NHWC", "HWIO", "NHWC"))


def residual_block_ref(x_nchw, params, stride):
    cin = x_nchw.shape[1]
    cout = params["w1"].shape[0]
    x = jnp.transpose(x_nchw, (0, 2, 3, 1))
    s1, b1 = _fold_bn(*params["bn1"])
    s2, b2 = _fold_bn(*params["bn2"])
    y = jnp.maximum(_conv_ref(x, params["w1"], stride, 1) * s1 + b1, 0.0)
    y = _conv_ref(y, params["w2"], 1, 1) * s2 + b2
    if stride != 1 or cin != cout:
        ss, bs = _fold_bn(*params["bns"])
        short = _conv_ref(x, params["ws"], stride, 0) * ss + bs
    else:
        short = x
    out = jnp.maximum(y + short, 0.0)
    return jnp.transpose(out, (0, 3, 1, 2))


# -----------------------------------------------------------------------------
if __name__ == "__main__":
    key = jax.random.PRNGKey(0)
    kx, kp1, kp2 = jax.random.split(key, 3)

    N, CIN, H, W = 2, 4, 16, 16
    x = jax.random.normal(kx, (N, CIN, H, W), jnp.float32)

    # bf16 GEMM operands vs f32 reference -> loose-but-meaningful tolerance.
    RTOL = ATOL = 5e-2

    # Case 1: downsampling block (stride=2, channel change -> conv shortcut)
    COUT, STRIDE = 8, 2
    params = init_params(kp1, CIN, COUT, STRIDE)
    out = residual_block_pallas(x, params, STRIDE)
    jax.block_until_ready(out)
    ref = residual_block_ref(x, params, STRIDE)
    assert out.shape == (N, COUT, H // STRIDE, W // STRIDE)
    assert jnp.allclose(out, ref, rtol=RTOL, atol=ATOL), (
        float(jnp.max(jnp.abs(out - ref))))

    # Case 2: identity-shortcut block (stride=1, same channels)
    params_id = init_params(kp2, CIN, CIN, 1)
    out_id = residual_block_pallas(x, params_id, 1)
    jax.block_until_ready(out_id)
    ref_id = residual_block_ref(x, params_id, 1)
    assert out_id.shape == (N, CIN, H, W)
    assert jnp.allclose(out_id, ref_id, rtol=RTOL, atol=ATOL), (
        float(jnp.max(jnp.abs(out_id - ref_id))))

    print("KERNEL_OK")
</pallas_src>

<mosaic_0001>
module attributes {stable_mosaic.version = 11 : i64} {
  func.func @_gemm_bias_relu_kernel(%arg0: i32, %arg1: memref<64x36xbf16, #tpu.memory_space<vmem>>, %arg2: memref<36x128xbf16, #tpu.memory_space<vmem>>, %arg3: memref<1x128xf32, #tpu.memory_space<vmem>>, %arg4: memref<64x128xbf16, #tpu.memory_space<vmem>>) attributes {dimension_semantics = [#tpu.dimension_semantics<parallel>], iteration_bounds = array<i64: 2>, scalar_prefetch = 0 : i64, scratch_operands = 0 : i64, tpu.core_type = #tpu.core_type<tc>, window_params = [{transform_indices = @transform_0, window_bounds = array<i64: 64, 36>}, {pipeline_mode = #tpu.pipeline_mode<synchronous>, transform_indices = @transform_1, window_bounds = array<i64: 36, 128>}, {pipeline_mode = #tpu.pipeline_mode<synchronous>, transform_indices = @transform_2, window_bounds = array<i64: 1, 128>}, {transform_indices = @transform_3, window_bounds = array<i64: 64, 128>}]} {
    %c0 = arith.constant 0 : index
    %c0_0 = arith.constant 0 : index
    %0 = vector.load %arg1[%c0, %c0_0] : memref<64x36xbf16, #tpu.memory_space<vmem>>, vector<64x36xbf16>
    %c0_1 = arith.constant 0 : index
    %c0_2 = arith.constant 0 : index
    %1 = vector.load %arg2[%c0_1, %c0_2] : memref<36x128xbf16, #tpu.memory_space<vmem>>, vector<36x128xbf16>
    %cst = arith.constant dense<0.000000e+00> : vector<64x128xf32>
    %2 = tpu.matmul %0, %1, %cst {dimension_numbers = #tpu.dot_dimension_numbers<[1], [0], [0], [1], [0, 0, 1, 1], [], []>} : vector<64x36xbf16>, vector<36x128xbf16>, vector<64x128xf32> -> vector<64x128xf32>
    %c0_3 = arith.constant 0 : index
    %c0_4 = arith.constant 0 : index
    %3 = vector.load %arg3[%c0_3, %c0_4] : memref<1x128xf32, #tpu.memory_space<vmem>>, vector<1x128xf32>
    %4 = vector.broadcast %3 : vector<1x128xf32> to vector<64x128xf32>
    %5 = arith.addf %2, %4 : vector<64x128xf32>
    %cst_5 = arith.constant 0.000000e+00 : f32
    %6 = vector.broadcast %cst_5 : f32 to vector<64x128xf32>
    %7 = arith.maximumf %5, %6 : vector<64x128xf32>
    %8 = arith.truncf %7 : vector<64x128xf32> to vector<64x128xbf16>
    %c0_6 = arith.constant 0 : index
    %c0_7 = arith.constant 0 : index
    %9 = vector.load %arg4[%c0_6, %c0_7] : memref<64x128xbf16, #tpu.memory_space<vmem>>, vector<64x128xbf16>
    tpu.vector_store %arg4[%c0_6, %c0_7], %8 {strides = array<i32>} : memref<64x128xbf16, #tpu.memory_space<vmem>>, vector<64x128xbf16>,
    return
  }
  func.func @transform_0(%arg0: i32) -> (i32, i32) {
    %c0_i32 = arith.constant 0 : i32
    %c0_i32_0 = arith.constant 0 : i32
    return %arg0, %c0_i32 : i32, i32
  }
  func.func @transform_1(%arg0: i32) -> (i32, i32) {
    %c0_i32 = arith.constant 0 : i32
    %c0_i32_0 = arith.constant 0 : i32
    %c0_i32_1 = arith.constant 0 : i32
    return %c0_i32, %c0_i32_0 : i32, i32
  }
  func.func @transform_2(%arg0: i32) -> (i32, i32) {
    %c0_i32 = arith.constant 0 : i32
    %c0_i32_0 = arith.constant 0 : i32
    %c0_i32_1 = arith.constant 0 : i32
    return %c0_i32, %c0_i32_0 : i32, i32
  }
  func.func @transform_3(%arg0: i32) -> (i32, i32) {
    %c0_i32 = arith.constant 0 : i32
    %c0_i32_0 = arith.constant 0 : i32
    return %arg0, %c0_i32 : i32, i32
  }
}

module attributes {stable_mosaic.version = 11 : i64} {
  func.func @_gemm_bias_relu_kernel(%arg0: i32, %arg1: memref<64x76xbf16, #tpu.memory_space<vmem>>, %arg2: memref<76x128xbf16, #tpu.memory_space<vmem>>, %arg3: memref<1x128xf32, #tpu.memory_space<vmem>>, %arg4: memref<64x128xf32, #tpu.memory_space<vmem>>) attributes {dimension_semantics = [#tpu.dimension_semantics<parallel>], iteration_bounds = array<i64: 2>, scalar_prefetch = 0 : i64, scratch_operands = 0 : i64, tpu.core_type = #tpu.core_type<tc>, window_params = [{transform_indices = @transform_0, window_bounds = array<i64: 64, 76>}, {pipeline_mode = #tpu.pipeline_mode<synchronous>, transform_indices = @transform_1, window_bounds = array<i64: 76, 128>}, {pipeline_mode = #tpu.pipeline_mode<synchronous>, transform_indices = @transform_2, window_bounds = array<i64: 1, 128>}, {transform_indices = @transform_3, window_bounds = array<i64: 64, 128>}]} {
    %c0 = arith.constant 0 : index
    %c0_0 = arith.constant 0 : index
    %0 = vector.load %arg1[%c0, %c0_0] : memref<64x76xbf16, #tpu.memory_space<vmem>>, vector<64x76xbf16>
    %c0_1 = arith.constant 0 : index
    %c0_2 = arith.constant 0 : index
    %1 = vector.load %arg2[%c0_1, %c0_2] : memref<76x128xbf16, #tpu.memory_space<vmem>>, vector<76x128xbf16>
    %cst = arith.constant dense<0.000000e+00> : vector<64x128xf32>
    %2 = tpu.matmul %0, %1, %cst {dimension_numbers = #tpu.dot_dimension_numbers<[1], [0], [0], [1], [0, 0, 1, 1], [], []>} : vector<64x76xbf16>, vector<76x128xbf16>, vector<64x128xf32> -> vector<64x128xf32>
    %c0_3 = arith.constant 0 : index
    %c0_4 = arith.constant 0 : index
    %3 = vector.load %arg3[%c0_3, %c0_4] : memref<1x128xf32, #tpu.memory_space<vmem>>, vector<1x128xf32>
    %4 = vector.broadcast %3 : vector<1x128xf32> to vector<64x128xf32>
    %5 = arith.addf %2, %4 : vector<64x128xf32>
    %cst_5 = arith.constant 0.000000e+00 : f32
    %6 = vector.broadcast %cst_5 : f32 to vector<64x128xf32>
    %7 = arith.maximumf %5, %6 : vector<64x128xf32>
    %c0_6 = arith.constant 0 : index
    %c0_7 = arith.constant 0 : index
    %8 = vector.load %arg4[%c0_6, %c0_7] : memref<64x128xf32, #tpu.memory_space<vmem>>, vector<64x128xf32>
    tpu.vector_store %arg4[%c0_6, %c0_7], %7 {strides = array<i32>} : memref<64x128xf32, #tpu.memory_space<vmem>>, vector<64x128xf32>,
    return
  }
  func.func @transform_0(%arg0: i32) -> (i32, i32) {
    %c0_i32 = arith.constant 0 : i32
    %c0_i32_0 = arith.constant 0 : i32
    return %arg0, %c0_i32 : i32, i32
  }
  func.func @transform_1(%arg0: i32) -> (i32, i32) {
    %c0_i32 = arith.constant 0 : i32
    %c0_i32_0 = arith.constant 0 : i32
    %c0_i32_1 = arith.constant 0 : i32
    return %c0_i32, %c0_i32_0 : i32, i32
  }
  func.func @transform_2(%arg0: i32) -> (i32, i32) {
    %c0_i32 = arith.constant 0 : i32
    %c0_i32_0 = arith.constant 0 : i32
    %c0_i32_1 = arith.constant 0 : i32
    return %c0_i32, %c0_i32_0 : i32, i32
  }
  func.func @transform_3(%arg0: i32) -> (i32, i32) {
    %c0_i32 = arith.constant 0 : i32
    %c0_i32_0 = arith.constant 0 : i32
    return %arg0, %c0_i32 : i32, i32
  }
}

</mosaic_0001>

<bundles_post_ra>
// kernel: residual_block_pallas.2
= control target key start
LH: loop header
LB: loop body
LE: loop exit
PB: predicated region body
PF: predicated region fallthrough
CT: control target
= control target key end

     0   :  { %s550_s12 = smov 0   ;;  %s586_s0 = inlined_call_operand.vmem [shape: bf16[128,36], index: 0, kind: input, shape index: {}]   ;;  %s587_s1 = inlined_call_operand.vmem [shape: bf16[36,128], index: 1, kind: input, shape index: {}]   ;;  %s588_s2 = inlined_call_operand.vmem [shape: f32[1,128], index: 2, kind: input, shape index: {}]   ;;  %s589_s3 = inlined_call_operand.vmem [shape: bf16[128,128], index: 3, kind: output, shape index: {}]  }
   0x1 LB: > { %s416_s13 = sadd.s32 4294967295, %s528_s12   ;;  %p420_p0 = scmp.ge.s32.totalorder %s528_s12, 1  ;;  %s528_s12 = sphi %s550_s12, %s13_s12  }
   0x2   : > { %p138_p1 = scmp.lt.s32.totalorder %s528_s12, 3 }
   0x4   : > { %p139_p2 = pnand %p420_p0, %p138_p1 }
   0x5   : > { %v515_v0 = vld [vmem:[%s587_s1] sm:$0xff] (!%p139_p2)   ;;  %v516_v1 = vld [vmem:[%s587_s1 + $0x8] sm:$0xff] (!%p139_p2)   ;;  %s421_s18 = sshll.u32 (!%p139_p2), %s416_s13, 3  ;;  %v517_v2 = vld [vmem:[%s587_s1 + $0x10] ss:$0 sps:$4 sm:$0x33] (!%p139_p2)  }
   0x6   : > { %142 = sbr.rel (%p139_p2) target bundleno = 240 (0xf0), region = 32  ;;  %485 = vmatprep.subr.bf16.mxu0 (!%p139_p2), %v515_v0  ;;  %499 = vmatprep.subr.bf16.mxu1 (!%p139_p2), %v515_v0  ;;  %p163_p3 = scmp.lt.s32.totalorder (!%p139_p2), %s421_s18, 15  ;;  %vm243_vm0 = vcmask (!%p139_p2), 1041408   ;;  %vm230_vm1 = vcmask (!%p139_p2), 293888   ;;  %v425_v8 = vld [vmem:[%s588_s2] ss:$0 sm:$0xff] (!%p139_p2) }
   0x7   : > { %486 = vmatpush3.bf16.msra.mxu0 (!%p139_p2), %v515_v0  ;;  %502 = vmatpush3.bf16.msra.mxu1 (!%p139_p2), %v515_v0  ;;  %v245_v3 = vsel (!%p139_p2), %vm243_vm0, %v517_v2, 0 }
   0x8   : > { %487 = vmatprep.subr.bf16.mxu0 (!%p139_p2), %v516_v1  ;;  %500 = vmatprep.subr.bf16.mxu1 (!%p139_p2), %v516_v1 }
   0xb   : > { %488 = vmatpush3.bf16.msra.mxu0 (!%p139_p2), %v516_v1  ;;  %503 = vmatpush3.bf16.msra.mxu1 (!%p139_p2), %v516_v1 }
   0xc   : > { %505 = vmatprep.subr.msk.bf16.mxu0 (!%p139_p2), %vm243_vm0, %v517_v2  ;;  %506 = vmatprep.subr.msk.bf16.mxu1 (!%p139_p2), %vm243_vm0, %v517_v2 }
   0xd   : > { %s591_s18 = smov (!%p163_p3, %s421_s18), 15 }
   0xe   : > { %s422_s21 = sshll.u32 %s591_s18, 2 }
   0xf   : > { %s166_s24 = scalar_lea.vmem %s586_s0, %s422_s21  ;;  %490 = vmatpush3.bf16.msra.mxu0 %v245_v3  ;;  %504 = vmatpush3.bf16.msra.mxu1 %v245_v3  ;;  %s172_s29 = scalar_lea.vmem %s589_s3, %s422_s21 }
  0x10   : > { %v518_v4 = vld [vmem:[%s166_s24] sm:$0xff]   ;;  %v519_v5 = vld [vmem:[%s166_s24 + $0x10] sm:$0xff]   ;;  %v520_v6 = vld [vmem:[%s166_s24 + $0x8] sm:$0xff]  }
  0x11   : > { %491 = vmatprep.mubr.msk.bf16.mxu0 %vm230_vm1, %v518_v4  ;;  %v521_v7 = vld [vmem:[%s166_s24 + $0x18] sm:$0xff]   ;;  %495 = vmatprep.mubr.msk.bf16.mxu1 %vm230_vm1, %v519_v5 }
  0x12   : > { %492 = vmatmul.mubr.msk.bf16.vlgmr.msra.gmra.mrb[0].mxu0 %vm230_vm1, %v520_v6  ;;  %496 = vmatmul.mubr.msk.bf16.vlgmr.msra.gmra.mrb[0].mxu1 %vm230_vm1, %v521_v7 }
  0xe5   : > { %v493_v9 = vpop.f32.mrb[0].mxu0  ;;  %v497_v10 = vpop.f32.mrb[0].mxu1 }
  0xe6   : > { %v290_v11 = vadd.f32 %v493_v9, %v425_v8  ;;  %v306_v12 = vadd.f32 %v497_v10, %v425_v8  ;;  %v281_v13 = vpop.f32.mrb[1].mxu0  ;;  %v297_v14 = vpop.f32.mrb[1].mxu1 }
  0xe7   : > { %v282_v15 = vadd.f32 %v425_v8, %v281_v13  ;;  %v298_v16 = vadd.f32 %v425_v8, %v297_v14  ;;  %v494_v17 = vpop.f32.mrb[2].mxu0  ;;  %v498_v18 = vpop.f32.mrb[2].mxu1 }
  0xe8   : > { %v293_v19 = vadd.f32 %v494_v17, %v425_v8  ;;  %v309_v20 = vadd.f32 %v498_v18, %v425_v8  ;;  %v284_v21 = vpop.f32.mrb[3].mxu0  ;;  %v300_v22 = vpop.f32.mrb[3].mxu1  ;;  %v314_v25 = vmax.f32 %v290_v11, 0.0  ;;  %v318_v26 = vmax.f32 %v306_v12, 0.0 }
  0xe9   : > { %v285_v23 = vadd.f32 %v425_v8, %v284_v21  ;;  %v301_v24 = vadd.f32 %v425_v8, %v300_v22  ;;  %v312_v29 = vmax.f32 %v282_v15, 0.0  ;;  %v316_v30 = vmax.f32 %v298_v16, 0.0 }
  0xea   : > { %v315_v27 = vmax.f32 %v293_v19, 0.0  ;;  %v319_v28 = vmax.f32 %v309_v20, 0.0 }
  0xeb   : > { %v313_v31 = vmax.f32 %v285_v23, 0.0  ;;  %v317_v32 = vmax.f32 %v301_v24, 0.0 }
  0xec   : > { %v463_v33 = vpack.c.bf16 %v315_v27, %v314_v25  ;;  %v473_v34 = vpack.c.bf16 %v319_v28, %v318_v26 }
  0xed   : > { %v458_v35 = vpack.c.bf16 %v313_v31, %v312_v29  ;;  %v468_v36 = vpack.c.bf16 %v317_v32, %v316_v30 }
  0xee   : > { %475 = vst [vmem:[%s172_s29 + $0x8] sm:$0xff] %v463_v33   ;;  %477 = vst [vmem:[%s172_s29 + $0x18] sm:$0xff] %v473_v34  }
  0xef   : > { %459 = vst [vmem:[%s172_s29] sm:$0xff] %v458_v35   ;;  %476 = vst [vmem:[%s172_s29 + $0x10] sm:$0xff] %v468_v36  }
  0xf0 PF: > { %s13_s12 = sadd.s32 1, %s528_s12  }
  0xf1   : > { %p10_p4 = scmp.ge.s32.totalorder %s13_s12, 4  }
  0xf3   :  { %12 = sbr.rel (!%p10_p4) target bundleno = 1 (0x1), region = 62 }

// kernel: residual_block_pallas.3
= control target key start
LH: loop header
LB: loop body
LE: loop exit
PB: predicated region body
PF: predicated region fallthrough
CT: control target
= control target key end

     0   :  { %s512_s12 = smov 0   ;;  %s555_s0 = inlined_call_operand.vmem [shape: bf16[128,76], index: 0, kind: input, shape index: {}]   ;;  %s556_s1 = inlined_call_operand.vmem [shape: bf16[76,128], index: 1, kind: input, shape index: {}]   ;;  %s557_s2 = inlined_call_operand.vmem [shape: f32[1,128], index: 2, kind: input, shape index: {}]   ;;  %s558_s3 = inlined_call_operand.vmem [shape: f32[128,128], index: 3, kind: output, shape index: {}]  }
   0x1 LB: > { %s403_s13 = sadd.s32 4294967295, %s490_s12   ;;  %p407_p0 = scmp.ge.s32.totalorder %s490_s12, 1  ;;  %s490_s12 = sphi %s512_s12, %s13_s12  }
   0x2   : > { %p138_p1 = scmp.lt.s32.totalorder %s490_s12, 3 }
   0x4   : > { %p139_p2 = pnand %p407_p0, %p138_p1 }
   0x5   : > { %v475_v0 = vld [vmem:[%s556_s1] sm:$0xff] (!%p139_p2)   ;;  %v476_v1 = vld [vmem:[%s556_s1 + $0x8] sm:$0xff] (!%p139_p2)   ;;  %s408_s18 = sshll.u32 (!%p139_p2), %s403_s13, 3  ;;  %v477_v2 = vld [vmem:[%s556_s1 + $0x10] sm:$0xff] (!%p139_p2)   ;;  %vm249_vm0 = vcmask (!%p139_p2), 621568   ;;  %vm262_vm1 = vcmask (!%p139_p2), 1045504  }
   0x6   : > { %142 = sbr.rel (%p139_p2) target bundleno = 246 (0xf6), region = 32  ;;  %437 = vmatprep.subr.bf16.mxu0 (!%p139_p2), %v475_v0  ;;  %455 = vmatprep.subr.bf16.mxu1 (!%p139_p2), %v475_v0  ;;  %p163_p3 = scmp.lt.s32.totalorder (!%p139_p2), %s408_s18, 15  ;;  %v478_v3 = vld [vmem:[%s556_s1 + $0x18] sm:$0xff] (!%p139_p2)   ;;  %v479_v6 = vld [vmem:[%s556_s1 + $0x20] sm:$0x3f] (!%p139_p2)  }
   0x7   : > { %438 = vmatpush3.bf16.msra.mxu0 (!%p139_p2), %v475_v0  ;;  %460 = vmatpush3.bf16.msra.mxu1 (!%p139_p2), %v475_v0  ;;  %v264_v7 = vsel (!%p139_p2), %vm262_vm1, %v479_v6, 0  ;;  %v412_v10 = vld [vmem:[%s557_s2] ss:$0 sm:$0xff] (!%p139_p2) }
   0x8   : > { %439 = vmatprep.subr.bf16.mxu0 (!%p139_p2), %v476_v1  ;;  %456 = vmatprep.subr.bf16.mxu1 (!%p139_p2), %v476_v1 }
   0xb   : > { %440 = vmatpush3.bf16.msra.mxu0 (!%p139_p2), %v476_v1  ;;  %461 = vmatpush3.bf16.msra.mxu1 (!%p139_p2), %v476_v1 }
   0xc   : > { %441 = vmatprep.subr.bf16.mxu0 (!%p139_p2), %v477_v2  ;;  %457 = vmatprep.subr.bf16.mxu1 (!%p139_p2), %v477_v2 }
   0xd   : > { %s560_s18 = smov (!%p163_p3, %s408_s18), 15 }
   0xe   : > { %s409_s21 = sshll.u32 %s560_s18, 2  ;;  %s411_s4 = sshll.u32 %s560_s18, 3 }
   0xf   : > { %s166_s26 = scalar_lea.vmem %s555_s0, %s409_s21  ;;  %442 = vmatpush3.bf16.msra.mxu0 %v477_v2  ;;  %462 = vmatpush3.bf16.msra.mxu1 %v477_v2  ;;  %s172_s7 = scalar_lea.vmem %s558_s3, %s411_s4 }
  0x10   : > { %v480_v4 = vld [vmem:[%s166_s26] sm:$0xff]   ;;  %v481_v5 = vld [vmem:[%s166_s26 + $0x10] sm:$0xff]   ;;  %443 = vmatprep.subr.bf16.mxu0 %v478_v3  ;;  %458 = vmatprep.subr.bf16.mxu1 %v478_v3  ;;  %v482_v8 = vld [vmem:[%s166_s26 + $0x8] sm:$0xff]  }
  0x11   : > { %447 = vmatprep.mubr.msk.bf16.mxu0 %vm249_vm0, %v480_v4  ;;  %451 = vmatprep.mubr.msk.bf16.mxu1 %vm249_vm0, %v481_v5  ;;  %v483_v9 = vld [vmem:[%s166_s26 + $0x18] sm:$0xff]  }
  0x13   : > { %444 = vmatpush3.bf16.msra.mxu0 %v478_v3  ;;  %463 = vmatpush3.bf16.msra.mxu1 %v478_v3 }
  0x14   : > { %465 = vmatprep.subr.msk.bf16.mxu0 %vm262_vm1, %v479_v6  ;;  %466 = vmatprep.subr.msk.bf16.mxu1 %vm262_vm1, %v479_v6 }
  0x17   : > { %446 = vmatpush3.bf16.msra.mxu0 %v264_v7  ;;  %464 = vmatpush3.bf16.msra.mxu1 %v264_v7 }
  0x1a   : > { %448 = vmatmul.mubr.msk.bf16.vlgmr.msra.gmra.mrb[0].mxu0 %vm249_vm0, %v482_v8  ;;  %452 = vmatmul.mubr.msk.bf16.vlgmr.msra.gmra.mrb[0].mxu1 %vm249_vm0, %v483_v9 }
  0xed   : > { %v449_v11 = vpop.f32.mrb[0].mxu0  ;;  %v453_v12 = vpop.f32.mrb[0].mxu1 }
  0xee   : > { %v309_v13 = vadd.f32 %v449_v11, %v412_v10  ;;  %v325_v14 = vadd.f32 %v453_v12, %v412_v10  ;;  %v300_v15 = vpop.f32.mrb[1].mxu0  ;;  %v316_v16 = vpop.f32.mrb[1].mxu1 }
  0xef   : > { %v301_v17 = vadd.f32 %v412_v10, %v300_v15  ;;  %v317_v18 = vadd.f32 %v412_v10, %v316_v16  ;;  %v450_v19 = vpop.f32.mrb[2].mxu0  ;;  %v454_v20 = vpop.f32.mrb[2].mxu1 }
  0xf0   : > { %v333_v21 = vmax.f32 %v309_v13, 0.0  ;;  %v337_v22 = vmax.f32 %v325_v14, 0.0  ;;  %v312_v23 = vadd.f32 %v450_v19, %v412_v10  ;;  %v328_v24 = vadd.f32 %v454_v20, %v412_v10  ;;  %v303_v25 = vpop.f32.mrb[3].mxu0  ;;  %v319_v26 = vpop.f32.mrb[3].mxu1 }
  0xf1   : > { %v331_v27 = vmax.f32 %v301_v17, 0.0  ;;  %v335_v28 = vmax.f32 %v317_v18, 0.0  ;;  %v304_v29 = vadd.f32 %v412_v10, %v303_v25  ;;  %v320_v30 = vadd.f32 %v412_v10, %v319_v26 }
  0xf2   : > { %341 = vst [vmem:[%s172_s7 + $0x10] sm:$0xff] %v333_v21  ;;  %345 = vst [vmem:[%s172_s7 + $0x30] sm:$0xff] %v337_v22  ;;  %v334_v31 = vmax.f32 %v312_v23, 0.0  ;;  %v338_v32 = vmax.f32 %v328_v24, 0.0 }
  0xf3   : > { %339 = vst [vmem:[%s172_s7] sm:$0xff] %v331_v27  ;;  %343 = vst [vmem:[%s172_s7 + $0x20] sm:$0xff] %v335_v28  ;;  %v332_v33 = vmax.f32 %v304_v29, 0.0  ;;  %v336_v34 = vmax.f32 %v320_v30, 0.0 }
  0xf4   : > { %342 = vst [vmem:[%s172_s7 + $0x18] sm:$0xff] %v334_v31  ;;  %346 = vst [vmem:[%s172_s7 + $0x38] sm:$0xff] %v338_v32 }
  0xf5   : > { %340 = vst [vmem:[%s172_s7 + $0x8] sm:$0xff] %v332_v33  ;;  %344 = vst [vmem:[%s172_s7 + $0x28] sm:$0xff] %v336_v34 }
  0xf6 PF: > { %s13_s12 = sadd.s32 1, %s490_s12  }
  0xf7   : > { %p10_p4 = scmp.ge.s32.totalorder %s13_s12, 4  }
  0xf9   :  { %12 = sbr.rel (!%p10_p4) target bundleno = 1 (0x1), region = 62 }

</bundles_post_ra>
